<compile_context>
chip_gen: v7x
topology: tpu7x:2x2x1
jax: 0.10.0
libtpu: 0.0.40
codegen_flags: <defaults>
</compile_context>

<pallas_src>
import functools

import jax
import jax.numpy as jnp
from jax import lax
from jax.experimental import pallas as pl
from jax.experimental.pallas import tpu as pltpu


def _round_up(v, m):
    return ((v + m - 1) // m) * m


def _vmem_capacity_bytes():
    """Per-TensorCore VMEM capacity; conservative 64 MiB (v7x) fallback."""
    try:
        info = pltpu.get_tpu_info()
        cap = getattr(info, "vmem_capacity_bytes", None)
        if cap:
            return int(cap)
    except Exception:
        pass
    return 64 * 1024 * 1024


def _ti_candidates(I):
    cands = [c for c in (2048, 1536, 1024, 768, 512, 384, 256, 128)
             if c <= I and I % c == 0]
    if I not in cands:
        cands = [I] + cands          # full-I block always legal
    return cands                     # descending preference


def _vmem_estimate(TM, TI, H, bp):
    return (2 * TM * H * bp          # x tile (double-buffered)
            + 2 * TM * H * bp        # out tile (double-buffered)
            + TM * H * 4             # f32 accumulator scratch
            + 2 * 2 * H * TI * bp    # gate + up chunks (double-buffered)
            + 2 * TI * H * bp        # down chunk (double-buffered)
            + 2 * TM * 4)            # routing column


def _select_tiles(T, H, I, bp, vmem_cap):
    """Largest (TM, TI) that fits ~75% of VMEM (keeps double-buffering)."""
    budget = int(vmem_cap * 0.75)
    t_cap = _round_up(T, 128)
    tm_cands = [c for c in (512, 384, 256, 128) if c <= t_cap] or [t_cap]
    ti_cands = _ti_candidates(I)
    for TM in tm_cands:
        for TI in ti_cands:
            if _vmem_estimate(TM, TI, H, bp) <= budget:
                return TM, TI
    return tm_cands[-1], ti_cands[-1]


# -----------------------------------------------------------------------------
# Pallas kernel.
# Grid = (token_tiles, experts, I_chunks) -> ("parallel","arbitrary","arbitrary")
# Output / f32 accumulator stay fixed across the two trailing reduction axes.
# Scalar-prefetch: per-(tile,expert) activity flags + weight-DMA dedup indices.
# -----------------------------------------------------------------------------
def _moe_kernel(flags_ref, fetch_ref, x_ref, gw_ref, uw_ref, dw_ref, w_ref,
                o_ref, acc_ref):
    del fetch_ref  # only used by the BlockSpec index_maps
    t = pl.program_id(0)
    e = pl.program_id(1)
    ic = pl.program_id(2)
    n_e = pl.num_programs(1)
    n_i = pl.num_programs(2)

    @pl.when(jnp.logical_and(e == 0, ic == 0))
    def _init():
        acc_ref[...] = jnp.zeros_like(acc_ref)

    flag = flags_ref[t * n_e + e]

    @pl.when(flag > 0)
    def _compute():
        x = x_ref[...]                                              # (TM, H)
        g = jnp.dot(x, gw_ref[...], preferred_element_type=jnp.float32)
        u = jnp.dot(x, uw_ref[...], preferred_element_type=jnp.float32)
        h = (g * jax.nn.sigmoid(g)) * u                             # (TM, TI) f32
        # Fold routing weight into the (TM, TI) activations in f32 before the
        # narrow-precision cast (cheaper than scaling the (TM, H) result).
        h = h * w_ref[...].astype(jnp.float32)                      # (TM, 1) bcast
        acc_ref[...] += jnp.dot(h.astype(x_ref.dtype), dw_ref[...],
                                preferred_element_type=jnp.float32)

    @pl.when(jnp.logical_and(e == n_e - 1, ic == n_i - 1))
    def _finalize():
        o_ref[...] = acc_ref[...].astype(o_ref.dtype)


def fused_moe(x, gate_w, up_w, down_w, routing_w):
    """x: (T, H); gate/up: (E, H, I); down: (E, I, H); routing_w: (T, E) dense
    (already includes always-on shared-expert columns). Returns (T, H)."""
    T, H = x.shape
    E, _, I = gate_w.shape
    dtype = x.dtype
    bp = jnp.dtype(dtype).itemsize

    vmem_cap = _vmem_capacity_bytes()
    TM, TI = _select_tiles(T, H, I, bp, vmem_cap)
    T_pad = _round_up(T, TM)
    n_t = T_pad // TM
    n_i = I // TI

    # Pad tokens; padded rows get zero routing weight -> contribute nothing.
    x_p = jnp.zeros((T_pad, H), dtype).at[:T].set(x)
    w_p = jnp.zeros((T_pad, E), jnp.float32).at[:T].set(
        routing_w.astype(jnp.float32))
    w_k = jnp.transpose(w_p, (1, 0))[..., None]          # (E, T_pad, 1)

    # Per-(tile, expert) activity flags + DMA-dedup fetch index: a dead
    # (tile, expert) repeats the last active expert's block so its weight DMA
    # is deduplicated away by the pipeline.
    flags = (w_p.reshape(n_t, TM, E) != 0).any(axis=1).astype(jnp.int32)
    e_ids = jnp.arange(E, dtype=jnp.int32)[None, :]
    masked = jnp.where(flags > 0, e_ids, -1)
    last_le = lax.cummax(masked, axis=1)                 # last active <= e
    first_active = jnp.argmax(flags, axis=1).astype(jnp.int32)[:, None]
    fetch = jnp.where(last_le >= 0, last_le, first_active).astype(jnp.int32)
    flags_flat = flags.reshape(-1)
    fetch_flat = fetch.reshape(-1)

    est = _vmem_estimate(TM, TI, H, bp)
    vmem_limit = int(min(vmem_cap, max(32 * 1024 * 1024, est * 5 // 4)))

    def x_map(t, e, i, flags_r, fetch_r):
        return (t, 0)

    def gu_map(t, e, i, flags_r, fetch_r):
        idx = t * E + e
        flag = flags_r[idx]
        # Dead (tile, expert): repeat the previous step's block (expert frozen
        # via fetch_r, chunk index frozen at n_i-1) -> no weight DMA.
        ii = i * flag + (n_i - 1) * (1 - flag)
        return (fetch_r[idx], 0, ii)

    def d_map(t, e, i, flags_r, fetch_r):
        idx = t * E + e
        flag = flags_r[idx]
        ii = i * flag + (n_i - 1) * (1 - flag)
        return (fetch_r[idx], ii, 0)

    def w_map(t, e, i, flags_r, fetch_r):
        return (e, t, 0)

    def o_map(t, e, i, flags_r, fetch_r):
        return (t, 0)

    cost = pl.CostEstimate(
        flops=int(6 * T_pad * H * I * E),
        transcendentals=int(T_pad * I * E),
        bytes_accessed=int(3 * E * H * I * bp + 2 * T_pad * H * bp
                           + T_pad * E * 4))

    # TODO(synk): for v7x decode (n_t == 1) the expert axis could be split
    # across the two TensorCores (two partial outputs + add) to use both cores.
    out = pl.pallas_call(
        _moe_kernel,
        out_shape=jax.ShapeDtypeStruct((T_pad, H), dtype),
        grid_spec=pltpu.PrefetchScalarGridSpec(
            num_scalar_prefetch=2,
            grid=(n_t, E, n_i),
            in_specs=[
                pl.BlockSpec((TM, H), x_map),            # x, resident per tile
                pl.BlockSpec((None, H, TI), gu_map),     # gate_proj chunk
                pl.BlockSpec((None, H, TI), gu_map),     # up_proj chunk
                pl.BlockSpec((None, TI, H), d_map),      # down_proj chunk
                pl.BlockSpec((None, TM, 1), w_map),      # routing column
            ],
            out_specs=pl.BlockSpec((TM, H), o_map),
            scratch_shapes=[pltpu.VMEM((TM, H), jnp.float32)],
        ),
        compiler_params=pltpu.CompilerParams(
            dimension_semantics=("parallel", "arbitrary", "arbitrary"),
            vmem_limit_bytes=vmem_limit),
        cost_estimate=cost,
    )(flags_flat, fetch_flat, x_p, gate_w, up_w, down_w, w_k)

    return out[:T]


# -----------------------------------------------------------------------------
# One-time parameter preparation (do at load time, NOT per forward call).
# -----------------------------------------------------------------------------
def prepare_moe_params(params, compute_dtype=jnp.bfloat16):
    gate_w = params["gate_proj"]
    up_w = params["up_proj"]
    down_w = params["down_proj"]
    E, H, I = gate_w.shape
    sg, su, sd = (params["shared_gate"], params["shared_up"],
                  params["shared_down"])
    I_sh = sg.shape[1]
    n_sh = I_sh // I
    assert n_sh * I == I_sh, "shared intermediate must be a multiple of moe I"
    sg_e = sg.reshape(H, n_sh, I).transpose(1, 0, 2)                # (n_sh,H,I)
    su_e = su.reshape(H, n_sh, I).transpose(1, 0, 2)
    sd_e = sd.reshape(n_sh, I, H)
    return {
        "router_w": params["router_w"].astype(jnp.float32),
        "gate_all": jnp.concatenate([gate_w, sg_e], axis=0).astype(compute_dtype),
        "up_all": jnp.concatenate([up_w, su_e], axis=0).astype(compute_dtype),
        "down_all": jnp.concatenate([down_w, sd_e], axis=0).astype(compute_dtype),
    }


# -----------------------------------------------------------------------------
# SigmaMoE_Acce forward (wrapper / glue in plain JAX). `prep` comes from
# prepare_moe_params (weights already fused + cast, no per-call weight prep).
# -----------------------------------------------------------------------------
def sigma_moe_forward(hidden_states, prep, *, num_experts_per_tok):
    B, S, H = hidden_states.shape
    x = hidden_states.reshape(-1, H)
    T = x.shape[0]
    gate_all = prep["gate_all"]
    up_all = prep["up_all"]
    down_all = prep["down_all"]
    router_w = prep["router_w"]
    E_total = gate_all.shape[0]
    E_routed = router_w.shape[0]
    n_sh = E_total - E_routed
    compute_dtype = gate_all.dtype

    # --- MoEGate: linear router -> softmax -> top-k (f32 routing math) ------
    # TODO(synk): MoEGate source not provided; DeepSeek-style softmax top-k
    # routing assumed (norm_topk_prob=False, no aux loss / scaling at eval).
    logits = x.astype(jnp.float32) @ router_w.T
    scores = jax.nn.softmax(logits, axis=-1)
    topk_w, topk_idx = lax.top_k(scores, num_experts_per_tok)
    dense_w = jnp.sum(
        jax.nn.one_hot(topk_idx, E_routed, dtype=jnp.float32)
        * topk_w[..., None], axis=1)                                 # (T, E_r)
    w_all = jnp.concatenate(
        [dense_w, jnp.ones((T, n_sh), jnp.float32)], axis=1)         # (T, E_total)

    y = fused_moe(x.astype(compute_dtype), gate_all, up_all, down_all, w_all)
    return y.astype(hidden_states.dtype).reshape(B, S, H)


# Pure-JAX reference with identical math, for the correctness check.
def sigma_moe_reference(hidden_states, params, *, num_experts_per_tok):
    B, S, H = hidden_states.shape
    x = hidden_states.reshape(-1, H)
    E = params["gate_proj"].shape[0]
    logits = x @ params["router_w"].T
    scores = jax.nn.softmax(logits, axis=-1)
    topk_w, topk_idx = lax.top_k(scores, num_experts_per_tok)
    dense_w = jnp.sum(
        jax.nn.one_hot(topk_idx, E, dtype=x.dtype) * topk_w[..., None], axis=1)

    def expert(xe, gw, uw, dw):
        return (jax.nn.silu(xe @ gw) * (xe @ uw)) @ dw

    per_e = jax.vmap(lambda gw, uw, dw: expert(x, gw, uw, dw))(
        params["gate_proj"], params["up_proj"], params["down_proj"])  # (E,T,H)
    y = jnp.einsum("eth,te->th", per_e, dense_w)
    y_shared = expert(x, params["shared_gate"], params["shared_up"],
                      params["shared_down"])
    return (y + y_shared).reshape(B, S, H)


if __name__ == "__main__":
    # Small config consistent with the module's forward.
    hidden_size = 128
    moe_intermediate_size = 128
    n_routed_experts = 4
    num_experts_per_tok = 2
    n_shared_experts = 1
    shared_intermediate = moe_intermediate_size * n_shared_experts
    B, S = 2, 8

    key = jax.random.PRNGKey(0)
    ks = jax.random.split(key, 8)
    scale = 0.05
    params = {
        "router_w": scale * jax.random.normal(
            ks[0], (n_routed_experts, hidden_size), jnp.float32),
        "gate_proj": scale * jax.random.normal(
            ks[1], (n_routed_experts, hidden_size, moe_intermediate_size),
            jnp.float32),
        "up_proj": scale * jax.random.normal(
            ks[2], (n_routed_experts, hidden_size, moe_intermediate_size),
            jnp.float32),
        "down_proj": scale * jax.random.normal(
            ks[3], (n_routed_experts, moe_intermediate_size, hidden_size),
            jnp.float32),
        "shared_gate": scale * jax.random.normal(
            ks[4], (hidden_size, shared_intermediate), jnp.float32),
        "shared_up": scale * jax.random.normal(
            ks[5], (hidden_size, shared_intermediate), jnp.float32),
        "shared_down": scale * jax.random.normal(
            ks[6], (shared_intermediate, hidden_size), jnp.float32),
    }
    x = jax.random.normal(ks[7], (B, S, hidden_size), jnp.float32)

    ref = sigma_moe_reference(x, params,
                              num_experts_per_tok=num_experts_per_tok)

    fwd = jax.jit(functools.partial(
        sigma_moe_forward, num_experts_per_tok=num_experts_per_tok))

    # f32 compute path: tight correctness check.
    prep_f32 = prepare_moe_params(params, compute_dtype=jnp.float32)
    out_f32 = jax.block_until_ready(fwd(x, prep_f32))
    assert out_f32.shape == (B, S, hidden_size)
    assert jnp.allclose(out_f32, ref, atol=1e-4, rtol=1e-4), "f32 mismatch"

    # bf16 compute path (default / fast): loose check vs f32 reference.
    prep_bf16 = prepare_moe_params(params, compute_dtype=jnp.bfloat16)
    out_bf16 = jax.block_until_ready(fwd(x, prep_bf16)).astype(jnp.float32)
    assert jnp.allclose(out_bf16, ref, atol=3e-2, rtol=3e-2), "bf16 mismatch"

    print("KERNEL_OK")
</pallas_src>

<mosaic_0001>
module attributes {stable_mosaic.version = 11 : i64} {
  func.func @_moe_kernel(%arg0: i32, %arg1: i32, %arg2: i32, %arg3: memref<5xi32, #tpu.memory_space<smem>>, %arg4: memref<5xi32, #tpu.memory_space<smem>>, %arg5: memref<128x128xf32, #tpu.memory_space<vmem>>, %arg6: memref<1x128x128xf32, #tpu.memory_space<vmem>>, %arg7: memref<1x128x128xf32, #tpu.memory_space<vmem>>, %arg8: memref<1x128x128xf32, #tpu.memory_space<vmem>>, %arg9: memref<1x128x1xf32, #tpu.memory_space<vmem>>, %arg10: memref<128x128xf32, #tpu.memory_space<vmem>>, %arg11: memref<128x128xf32, #tpu.memory_space<vmem>>) attributes {dimension_semantics = [#tpu.dimension_semantics<parallel>, #tpu.dimension_semantics<arbitrary>, #tpu.dimension_semantics<arbitrary>], iteration_bounds = array<i64: 1, 5, 1>, scalar_prefetch = 2 : i64, scratch_operands = 1 : i64, tpu.core_type = #tpu.core_type<tc>, window_params = [{transform_indices = @transform_0, window_bounds = array<i64: 128, 128>}, {transform_indices = @transform_1, window_bounds = array<i64: 1, 128, 128>}, {transform_indices = @transform_2, window_bounds = array<i64: 1, 128, 128>}, {transform_indices = @transform_3, window_bounds = array<i64: 1, 128, 128>}, {transform_indices = @transform_4, window_bounds = array<i64: 1, 128, 1>}, {transform_indices = @transform_5, window_bounds = array<i64: 128, 128>}]} {
    %c0_i32 = arith.constant 0 : i32
    %0 = arith.cmpi eq, %arg1, %c0_i32 : i32
    %c0_i32_0 = arith.constant 0 : i32
    %1 = arith.cmpi eq, %arg2, %c0_i32_0 : i32
    %2 = arith.andi %0, %1 : i1
    %3 = arith.extui %2 : i1 to i32
    %c0_i32_1 = arith.constant 0 : i32
    %4 = arith.cmpi ne, %3, %c0_i32_1 : i32
    scf.if %4 {
      %cst = arith.constant 0.000000e+00 : f32
      %17 = vector.broadcast %cst : f32 to vector<128x128xf32>
      %c0 = arith.constant 0 : index
      %c0_6 = arith.constant 0 : index
      %18 = vector.load %arg11[%c0, %c0_6] : memref<128x128xf32, #tpu.memory_space<vmem>>, vector<128x128xf32>
      tpu.vector_store %arg11[%c0, %c0_6], %17 {strides = array<i32>} : memref<128x128xf32, #tpu.memory_space<vmem>>, vector<128x128xf32>,
    } else {
    }
    %c5_i32 = arith.constant 5 : i32
    %5 = arith.muli %arg0, %c5_i32 : i32
    %6 = arith.addi %5, %arg1 : i32
    %7 = arith.index_cast %6 : i32 to index
    %8 = memref.load %arg3[%7] : memref<5xi32, #tpu.memory_space<smem>>
    %c0_i32_2 = arith.constant 0 : i32
    %9 = arith.cmpi sgt, %8, %c0_i32_2 : i32
    %10 = arith.extui %9 : i1 to i32
    %c0_i32_3 = arith.constant 0 : i32
    %11 = arith.cmpi ne, %10, %c0_i32_3 : i32
    scf.if %11 {
      %c0 = arith.constant 0 : index
      %c0_6 = arith.constant 0 : index
      %17 = vector.load %arg5[%c0, %c0_6] : memref<128x128xf32, #tpu.memory_space<vmem>>, vector<128x128xf32>
      %c0_7 = arith.constant 0 : index
      %c0_8 = arith.constant 0 : index
      %c0_9 = arith.constant 0 : index
      %18 = vector.load %arg6[%c0_7, %c0_8, %c0_9] : memref<1x128x128xf32, #tpu.memory_space<vmem>>, vector<1x128x128xf32>
      %19 = vector.shape_cast %18 : vector<1x128x128xf32> to vector<128x128xf32>
      %cst = arith.constant dense<0.000000e+00> : vector<128x128xf32>
      %20 = tpu.matmul %17, %19, %cst {dimension_numbers = #tpu.dot_dimension_numbers<[1], [0], [0], [1], [0, 0, 1, 1], [], []>} : vector<128x128xf32>, vector<128x128xf32>, vector<128x128xf32> -> vector<128x128xf32>
      %c0_10 = arith.constant 0 : index
      %c0_11 = arith.constant 0 : index
      %c0_12 = arith.constant 0 : index
      %21 = vector.load %arg7[%c0_10, %c0_11, %c0_12] : memref<1x128x128xf32, #tpu.memory_space<vmem>>, vector<1x128x128xf32>
      %22 = vector.shape_cast %21 : vector<1x128x128xf32> to vector<128x128xf32>
      %cst_13 = arith.constant dense<0.000000e+00> : vector<128x128xf32>
      %23 = tpu.matmul %17, %22, %cst_13 {dimension_numbers = #tpu.dot_dimension_numbers<[1], [0], [0], [1], [0, 0, 1, 1], [], []>} : vector<128x128xf32>, vector<128x128xf32>, vector<128x128xf32> -> vector<128x128xf32>
      %24 = arith.negf %20 : vector<128x128xf32>
      %25 = math.exp %24 : vector<128x128xf32>
      %cst_14 = arith.constant 1.000000e+00 : f32
      %26 = vector.broadcast %cst_14 : f32 to vector<128x128xf32>
      %27 = arith.addf %26, %25 : vector<128x128xf32>
      %28 = arith.divf %26, %27 : vector<128x128xf32>
      %29 = arith.mulf %20, %28 : vector<128x128xf32>
      %30 = arith.mulf %29, %23 : vector<128x128xf32>
      %c0_15 = arith.constant 0 : index
      %c0_16 = arith.constant 0 : index
      %c0_17 = arith.constant 0 : index
      %31 = vector.load %arg9[%c0_15, %c0_16, %c0_17] : memref<1x128x1xf32, #tpu.memory_space<vmem>>, vector<1x128x1xf32>
      %32 = vector.shape_cast %31 : vector<1x128x1xf32> to vector<128x1xf32>
      %33 = vector.broadcast %32 : vector<128x1xf32> to vector<128x128xf32>
      %34 = arith.mulf %30, %33 : vector<128x128xf32>
      %c0_18 = arith.constant 0 : index
      %c0_19 = arith.constant 0 : index
      %35 = vector.load %arg11[%c0_18, %c0_19] : memref<128x128xf32, #tpu.memory_space<vmem>>, vector<128x128xf32>
      %c0_20 = arith.constant 0 : index
      %c0_21 = arith.constant 0 : index
      %c0_22 = arith.constant 0 : index
      %36 = vector.load %arg8[%c0_20, %c0_21, %c0_22] : memref<1x128x128xf32, #tpu.memory_space<vmem>>, vector<1x128x128xf32>
      %37 = vector.shape_cast %36 : vector<1x128x128xf32> to vector<128x128xf32>
      %cst_23 = arith.constant dense<0.000000e+00> : vector<128x128xf32>
      %38 = tpu.matmul %34, %37, %cst_23 {dimension_numbers = #tpu.dot_dimension_numbers<[1], [0], [0], [1], [0, 0, 1, 1], [], []>} : vector<128x128xf32>, vector<128x128xf32>, vector<128x128xf32> -> vector<128x128xf32>
      %39 = arith.addf %35, %38 : vector<128x128xf32>
      %c0_24 = arith.constant 0 : index
      %c0_25 = arith.constant 0 : index
      %40 = vector.load %arg11[%c0_24, %c0_25] : memref<128x128xf32, #tpu.memory_space<vmem>>, vector<128x128xf32>
      tpu.vector_store %arg11[%c0_24, %c0_25], %39 {strides = array<i32>} : memref<128x128xf32, #tpu.memory_space<vmem>>, vector<128x128xf32>,
    } else {
    }
    %c4_i32 = arith.constant 4 : i32
    %12 = arith.cmpi eq, %arg1, %c4_i32 : i32
    %c0_i32_4 = arith.constant 0 : i32
    %13 = arith.cmpi eq, %arg2, %c0_i32_4 : i32
    %14 = arith.andi %12, %13 : i1
    %15 = arith.extui %14 : i1 to i32
    %c0_i32_5 = arith.constant 0 : i32
    %16 = arith.cmpi ne, %15, %c0_i32_5 : i32
    scf.if %16 {
      %c0 = arith.constant 0 : index
      %c0_6 = arith.constant 0 : index
      %17 = vector.load %arg11[%c0, %c0_6] : memref<128x128xf32, #tpu.memory_space<vmem>>, vector<128x128xf32>
      %c0_7 = arith.constant 0 : index
      %c0_8 = arith.constant 0 : index
      %18 = vector.load %arg10[%c0_7, %c0_8] : memref<128x128xf32, #tpu.memory_space<vmem>>, vector<128x128xf32>
      tpu.vector_store %arg10[%c0_7, %c0_8], %17 {strides = array<i32>} : memref<128x128xf32, #tpu.memory_space<vmem>>, vector<128x128xf32>,
    } else {
    }
    return
  }
  func.func @transform_0(%arg0: i32, %arg1: i32, %arg2: i32, %arg3: memref<5xi32, #tpu.memory_space<smem>>, %arg4: memref<5xi32, #tpu.memory_space<smem>>) -> (i32, i32) {
    %c0_i32 = arith.constant 0 : i32
    %c0_i32_0 = arith.constant 0 : i32
    return %arg0, %c0_i32 : i32, i32
  }
  func.func @transform_1(%arg0: i32, %arg1: i32, %arg2: i32, %arg3: memref<5xi32, #tpu.memory_space<smem>>, %arg4: memref<5xi32, #tpu.memory_space<smem>>) -> (i32, i32, i32) {
    %c5_i32 = arith.constant 5 : i32
    %0 = arith.muli %arg0, %c5_i32 : i32
    %1 = arith.addi %0, %arg1 : i32
    %2 = arith.index_cast %1 : i32 to index
    %3 = memref.load %arg3[%2] : memref<5xi32, #tpu.memory_space<smem>>
    %4 = arith.muli %arg2, %3 : i32
    %c1_i32 = arith.constant 1 : i32
    %5 = arith.subi %c1_i32, %3 : i32
    %c0_i32 = arith.constant 0 : i32
    %6 = arith.muli %c0_i32, %5 : i32
    %7 = arith.addi %4, %6 : i32
    %8 = arith.index_cast %1 : i32 to index
    %9 = memref.load %arg4[%8] : memref<5xi32, #tpu.memory_space<smem>>
    %c0_i32_0 = arith.constant 0 : i32
    %c0_i32_1 = arith.constant 0 : i32
    return %9, %c0_i32_0, %7 : i32, i32, i32
  }
  func.func @transform_2(%arg0: i32, %arg1: i32, %arg2: i32, %arg3: memref<5xi32, #tpu.memory_space<smem>>, %arg4: memref<5xi32, #tpu.memory_space<smem>>) -> (i32, i32, i32) {
    %c5_i32 = arith.constant 5 : i32
    %0 = arith.muli %arg0, %c5_i32 : i32
    %1 = arith.addi %0, %arg1 : i32
    %2 = arith.index_cast %1 : i32 to index
    %3 = memref.load %arg3[%2] : memref<5xi32, #tpu.memory_space<smem>>
    %4 = arith.muli %arg2, %3 : i32
    %c1_i32 = arith.constant 1 : i32
    %5 = arith.subi %c1_i32, %3 : i32
    %c0_i32 = arith.constant 0 : i32
    %6 = arith.muli %c0_i32, %5 : i32
    %7 = arith.addi %4, %6 : i32
    %8 = arith.index_cast %1 : i32 to index
    %9 = memref.load %arg4[%8] : memref<5xi32, #tpu.memory_space<smem>>
    %c0_i32_0 = arith.constant 0 : i32
    %c0_i32_1 = arith.constant 0 : i32
    return %9, %c0_i32_0, %7 : i32, i32, i32
  }
  func.func @transform_3(%arg0: i32, %arg1: i32, %arg2: i32, %arg3: memref<5xi32, #tpu.memory_space<smem>>, %arg4: memref<5xi32, #tpu.memory_space<smem>>) -> (i32, i32, i32) {
    %c5_i32 = arith.constant 5 : i32
    %0 = arith.muli %arg0, %c5_i32 : i32
    %1 = arith.addi %0, %arg1 : i32
    %2 = arith.index_cast %1 : i32 to index
    %3 = memref.load %arg3[%2] : memref<5xi32, #tpu.memory_space<smem>>
    %4 = arith.muli %arg2, %3 : i32
    %c1_i32 = arith.constant 1 : i32
    %5 = arith.subi %c1_i32, %3 : i32
    %c0_i32 = arith.constant 0 : i32
    %6 = arith.muli %c0_i32, %5 : i32
    %7 = arith.addi %4, %6 : i32
    %8 = arith.index_cast %1 : i32 to index
    %9 = memref.load %arg4[%8] : memref<5xi32, #tpu.memory_space<smem>>
    %c0_i32_0 = arith.constant 0 : i32
    %c0_i32_1 = arith.constant 0 : i32
    return %9, %7, %c0_i32_0 : i32, i32, i32
  }
  func.func @transform_4(%arg0: i32, %arg1: i32, %arg2: i32, %arg3: memref<5xi32, #tpu.memory_space<smem>>, %arg4: memref<5xi32, #tpu.memory_space<smem>>) -> (i32, i32, i32) {
    %c0_i32 = arith.constant 0 : i32
    %c0_i32_0 = arith.constant 0 : i32
    return %arg1, %arg0, %c0_i32 : i32, i32, i32
  }
  func.func @transform_5(%arg0: i32, %arg1: i32, %arg2: i32, %arg3: memref<5xi32, #tpu.memory_space<smem>>, %arg4: memref<5xi32, #tpu.memory_space<smem>>) -> (i32, i32) {
    %c0_i32 = arith.constant 0 : i32
    %c0_i32_0 = arith.constant 0 : i32
    return %arg0, %c0_i32 : i32, i32
  }
}

</mosaic_0001>

<bundles_post_ra>
// kernel: sigma_moe_forward.1
= control target key start
LH: loop header
LB: loop body
LE: loop exit
PB: predicated region body
PF: predicated region fallthrough
CT: control target
= control target key end

     0   :  { %s2865_s0 = inlined_call_operand.vmem [shape: s32[5], index: 0, kind: input, shape index: {}]   ;;  %s2866_s2 = inlined_call_operand.vmem [shape: f32[128,128], index: 2, kind: input, shape index: {}]   ;;  %s2867_s3 = inlined_call_operand.vmem [shape: f32[5,128,128], index: 3, kind: input, shape index: {}]   ;;  %s2868_s4 = inlined_call_operand.hbm [shape: f32[5,128,128], index: 4, kind: input, shape index: {}]   ;;  %s2869_s5 = inlined_call_operand.hbm [shape: f32[5,128,128], index: 5, kind: input, shape index: {}]   ;;  %s2870_s6 = inlined_call_operand.vmem [shape: f32[5,128,1], index: 6, kind: input, shape index: {}]   ;;  %s2871_s7 = inlined_call_operand.vmem [shape: f32[128,128], index: 7, kind: output, shape index: {}]   ;;  %s2872_s1 = inlined_call_operand.vmem [shape: s32[5], index: 1, kind: input, shape index: {}]  }
   0x1   :  { %2879 = sst [smem:[#allocation18_spill]] %s2868_s4  ;;  %s12_s26 = sshll.u32 %s2865_s0, 4  ;;  %s13_s26 = int_to_ptr.vmem [resolvable:$true] %s12_s26 }
   0x2   :  { %s16_s29 = sshll.u32 %s2872_s1, 4  ;;  %s2083_s30 = scalar_lea.vmem %s13_s26, 16  ;;  %s17_s29 = int_to_ptr.vmem [resolvable:$true] %s16_s29 }
   0x3   :  { %p2084_p0 = scmp.ne.s32.totalorder %s13_s26, %s2083_s30  ;;  %p2088_p1 = scmp.lt.s32.totalorder %s13_s26, %s13_s26 }
   0x4   :  { %p2089_p2 = scmp.lt.s32.totalorder %s2083_s30, %s2083_s30 }
   0x6   :  { %p2090_p3 = por %p2089_p2, %p2088_p1 }
   0x8   :  { %p2091_p4 = pnand %p2090_p3, %p2084_p0 }
   0xa   :  { %2094 = shalt.err (!%p2091_p4)  }
   0xb   :  { %s2249_s8 = smov [#allocation4]   ;;  %s2095_s9 = scalar_lea.vmem %s17_s29, 16 }
   0xc   :  { %15 = dma.vmem_to_smem %s13_s26, 16, %s2249_s8, [#allocation3] }
   0xd   :  { %p2096_p5 = scmp.ne.s32.totalorder %s17_s29, %s2095_s9  ;;  %p2100_p6 = scmp.lt.s32.totalorder %s17_s29, %s17_s29 }
   0xe   :  { %p2101_p7 = scmp.lt.s32.totalorder %s2095_s9, %s2095_s9 }
  0x10   :  { %p2102_p8 = por %p2101_p7, %p2100_p6 }
  0x12   :  { %p2103_p9 = pnand %p2102_p8, %p2096_p5 }
  0x14   :  { %2106 = shalt.err (!%p2103_p9)  }
  0x15   :  { %s2250_s0 = smov [#allocation5]  }
  0x16   :  { %19 = dma.vmem_to_smem %s17_s29, 16, %s2250_s0, [#allocation3] }
  0x17   :  { %2203 = dma.done.wait [#allocation3], 32 }
  0x18   :  { %2204 = vsyncadd [#allocation3], 4294967264 }
  0x19   :  { %21 = sfence }
  0x1a   :  { %22 = vsyncpa [#allocation7], 0 }
  0x1b   :  { %24 = vsyncpa [#allocation7 + $0x1], 0 }
  0x1c   :  { %25 = vsyncpa [#allocation9], 0 }
  0x1d   :  { %27 = vsyncpa [#allocation9 + $0x1], 0  ;;  %s2303_s1 = smov 0   ;;  %s2305_s10 = smov 0  }
  0x1e   :  { %s2307_s11 = smov 0   ;;  %s2309_s12 = smov 0  }
  0x1f   :  { %s2311_s13 = smov 0   ;;  %s2313_s14 = smov 0  }
  0x20   :  { %s2315_s15 = smov 0   ;;  %s2317_s16 = smov 0  }
  0x21   :  { %s2319_s17 = smov 0  }
  0x22 LB: > { %s48_s18 = sadd.s32 1, %s2243_s16  ;;  %s1497_s19 = sadd.s32 4294967295, %s2247_s17   ;;  %s2247_s17 = sphi %s2319_s17, %s33_s17   ;;  %s2243_s16 = sphi %s2317_s16, %s2907_s16   ;;  %s2239_s15 = sphi %s2315_s15, %s2906_s15   ;;  %s2235_s14 = sphi %s2313_s14, %s2905_s14   ;;  %s2231_s13 = sphi %s2311_s13, %s2904_s13   ;;  %s2227_s12 = sphi %s2309_s12, %s2903_s12   ;;  %s2223_s11 = sphi %s2307_s11, %s2902_s11   ;;  %s2219_s10 = sphi %s2305_s10, %s2901_s10   ;;  %s2215_s1 = sphi %s2303_s1, %s2900_s1  }
  0x23   : > { %p50_p10 = scmp.ge.s32.totalorder %s48_s18, 5  ;;  %s124_s20 = sld [smem:[#allocation5 + %s2243_s16]] }
  0x24   : > { %p142_p11 = scmp.ne.s32.totalorder %s2235_s14, %s2231_s13  ;;  %p2875_p12 = scmp.eq.s32.totalorder %s2247_s17, 0 }
  0x25   : > { %s2909_s18 = smov (%p50_p10, %s48_s18), 0  ;;  %p148_p13 = scmp.ne.s32.totalorder %s2231_s13, %s2227_s12 }
  0x26   : > { %2880 = sst [smem:[#allocation17_spill]] %s2909_s18  ;;  %p2356_p0 = scmp.eq.s32.totalorder %s1497_s19, 0 }
  0x27   : > { %s129_s21 = sld [smem:[#allocation5 + %s2909_s18]]  ;;  %s135_s23 = sadd.s32 1, %s2235_s14 }
  0x28   : > { %p2363_p1 = por %p2875_p12, %p142_p11  ;;  %p2369_p2 = por %p2356_p0, %p148_p13 }
  0x29   : > { %s2374_s26 = sld [smem:[#allocation5 + %s2243_s16]]  ;;  %s294_s27 = sand.u32 1, %s2235_s14  }
  0x2a   : > { %s2883_s25 = scalar_select %p2369_p2, 1, 0 }
  0x2b   : > { %p2874_p3 = scmp.lt.s32.totalorder %s2247_s17, 5  ;;  %s1501_s28 = sshll.u32 %s294_s27, 7 }
  0x2c   : > { %s298_s8 = scalar_lea.vmem [#allocation6], %s1501_s28  ;;  %p1507_p6 = scmp.ge.s32.totalorder %s2247_s17, 1 }
  0x2d   : > { %s130_s29 = ssub.s32 %s124_s20, %s129_s21  ;;  %p2382_p4 = pnand %p2874_p3, %p2363_p1 }
  0x2e   : > { %p133_p5 = scmp.eq.s32.totalorder %s130_s29, 0  ;;  %s311_s9 = sshll.u32 %s298_s8, 4  ;;  %s2398_s9 = int_to_ptr.vmem [resolvable:$true] %s311_s9 }
  0x2f   : > { %s1919_s0 = scalar_select %p2363_p1, [#allocation5], [#allocation10] }
  0x30   : > { %s2389_s12 = scalar_select %p133_p5, %s2235_s14, %s135_s23  }
  0x31   : > { %s1920_s19 = scalar_select %p2363_p1, %s2243_s16, 0 }
  0x32   : > { %s2911_s0 = smov (!%p2874_p3, %s1919_s0), [#allocation12]  ;;  %p360_p7 = scmp.lt.s32.totalorder %s2247_s17, 6 }
  0x33   : > { %s2913_s19 = smov (!%p2874_p3, %s1920_s19), 0  ;;  %s2407_s28 = sld [smem:[#allocation5 + %s2909_s18]] }
  0x34   : > { %s303_s20 = sld [smem:[%s2911_s0 + %s2913_s19]]  ;;  %p2402_p8 = pnand %p1507_p6, %p360_p7 }
  0x35   : > { %s2886_s4 = sld [smem:[#allocation18_spill]]  ;;  %s2416_s0 = scalar_lea.sflag [#allocation7], %s294_s27 }
  0x36   : > { %s2885_s21 = scalar_select %p2402_p8, 1, 0 }
  0x37   : > { %p2109_p11 = pneg %p2382_p4 }
  0x3a   : > { %s1537_s23 = sshll.u32 %s303_s20, 11 }
  0x3b   : > { %s2412_s8 = scalar_lea.hbm %s2886_s4, %s1537_s23  ;;  %s2112_s23 = scalar_lea.hbm %s2886_s4, 10240 }
  0x3c   : > { %s2107_s19 = scalar_lea.hbm %s2412_s8, 2048  ;;  %p2113_p5 = scmp.lt.u32.totalorder %s2412_s8, %s2886_s4 }
  0x3d   : > { %p2108_p10 = scmp.ne.s32.totalorder %s2412_s8, %s2107_s19  ;;  %p2114_p6 = scmp.lt.u32.totalorder %s2112_s23, %s2107_s19 }
  0x3e   : > { %p2116_p3 = scmp.lt.u32.totalorder %s2107_s19, %s2412_s8 }
  0x3f   : > { %p2110_p13 = pnand %p2109_p11, %p2108_p10  ;;  %p2115_p7 = por %p2114_p6, %p2113_p5 }
  0x41   : > { %p2111_p1 = pneg %p2110_p13  ;;  %p2117_p9 = por %p2116_p3, %p2115_p7 }
  0x43   : > { %p2118_p12 = pnand %p2117_p9, %p2111_p1 }
  0x45   : > { %2121 = shalt.err (!%p2118_p12)
}
  0x46   : > { %s2122_s27 = scalar_lea.vmem %s2398_s9, 2048  ;;  %s2251_s18 = smov [#allocation6]  }
  0x47   : > { %p2123_p10 = scmp.ne.s32.totalorder %s2398_s9, %s2122_s27  ;;  %s2127_s20 = sshll.u32 %s2251_s18, 4  ;;  %s2128_s20 = int_to_ptr.vmem [resolvable:$false] %s2127_s20 }
  0x48   : > { %s2129_s24 = scalar_lea.vmem %s2128_s20, 4096  ;;  %p2130_p8 = scmp.lt.s32.totalorder %s2398_s9, %s2128_s20 }
  0x49   : > { %p2125_p13 = pnand %p2123_p10, %p2109_p11  ;;  %p2131_p5 = scmp.lt.s32.totalorder %s2129_s24, %s2122_s27 }
  0x4b   : > { %p2126_p2 = pneg %p2125_p13  ;;  %p2132_p6 = por %p2131_p5, %p2130_p8 }
  0x4d   : > { %p2133_p3 = pnand %p2132_p6, %p2126_p2 }
  0x4f   : > { %2136 = shalt.err (!%p2133_p3)
}
  0x50   : > { %s2877_s19 = smov 128   ;;  %s2878_s23 = smov 8  }
  0x51   : > { %1932 = dma.hbm_to_vmem [thread:$0]  (!%p2382_p4), %s2412_s8, 2048, %s2398_s9, %s2416_s0, %s2877_s19, %s2877_s19, %s2878_s23  }
  0x52   : > { %p186_p12 = scmp.ne.s32.totalorder %s2219_s10, %s2215_s1  ;;  %s173_s29 = sadd.s32 1, %s2223_s11 }
  0x53   : > { %p2887_p2 = scmp.eq.s32.totalorder %s2247_s17, 0  ;;  %p2888_p8 = scmp.ne.s32.totalorder %s2223_s11, %s2219_s10 }
  0x54   : > { %s168_s27 = ssub.s32 %s2374_s26, %s2407_s28  ;;  %p2459_p11 = por %p186_p12, %p2356_p0 }
  0x55   : > { %p182_p9 = por %p2888_p8, %p2887_p2  ;;  %p171_p1 = scmp.eq.s32.totalorder %s168_s27, 0 }
  0x56   : > { %s321_s20 = sand.u32 1, %s2223_s11   ;;  %p2890_p7 = scmp.lt.s32.totalorder %s2247_s17, 5 }
  0x57   : > { %s2471_s9 = scalar_select %p171_p1, %s2223_s11, %s173_s29  }
  0x58   : > { %p2466_p10 = pnand %p2890_p7, %p182_p9  ;;  %s1504_s1 = sshll.u32 %s321_s20, 7 }
  0x59   : > { %s1922_s8 = scalar_select %p182_p9, [#allocation5], [#allocation11] }
  0x5a   : > { %s1923_s0 = scalar_select %p182_p9, %s2243_s16, 0 }
  0x5b   : > { %p2892_p4 = pmov %p2890_p7  ;;  %s325_s26 = scalar_lea.vmem [#allocation8], %s1504_s1 }
  0x5c   : > { %s339_s28 = sshll.u32 %s325_s26, 4  ;;  %s2485_s29 = scalar_lea.sflag [#allocation9], %s321_s20  ;;  %s2478_s28 = int_to_ptr.vmem [resolvable:$true] %s339_s28 }
  0x5d   : > { %s2915_s8 = smov (!%p2892_p4, %s1922_s8), [#allocation13]  ;;  %p2893_p0 = pmov %p2892_p4 }
  0x5e   : > { %p2139_p5 = pneg %p2466_p10  ;;  %s2142_s19 = scalar_lea.hbm %s2869_s5, 10240 }
  0x5f   : > { %s2917_s0 = smov (!%p2893_p0, %s1923_s0), 0 }
  0x60   : > { %s330_s22 = sld [smem:[%s2915_s8 + %s2917_s0]] }
  0x66   : > { %s1538_s24 = sshll.u32 %s330_s22, 11 }
  0x67   : > { %s2483_s23 = scalar_lea.hbm %s2869_s5, %s1538_s24 }
  0x68   : > { %s2137_s4 = scalar_lea.hbm %s2483_s23, 2048  ;;  %p2143_p12 = scmp.lt.u32.totalorder %s2483_s23, %s2869_s5 }
  0x69   : > { %p2138_p13 = scmp.ne.s32.totalorder %s2483_s23, %s2137_s4  ;;  %p2144_p2 = scmp.lt.u32.totalorder %s2142_s19, %s2137_s4 }
  0x6a   : > { %p2146_p9 = scmp.lt.u32.totalorder %s2137_s4, %s2483_s23 }
  0x6b   : > { %p2140_p6 = pnand %p2139_p5, %p2138_p13  ;;  %p2145_p8 = por %p2144_p2, %p2143_p12 }
  0x6d   : > { %p2141_p3 = pneg %p2140_p6  ;;  %p2147_p1 = por %p2146_p9, %p2145_p8 }
  0x6f   : > { %p2148_p7 = pnand %p2147_p1, %p2141_p3 }
  0x71   : > { %2151 = shalt.err (!%p2148_p7)
}
  0x72   : > { %s2152_s20 = scalar_lea.vmem %s2478_s28, 2048  ;;  %s2254_s26 = smov [#allocation8]  }
  0x73   : > { %p2153_p4 = scmp.ne.s32.totalorder %s2478_s28, %s2152_s20  ;;  %s2157_s24 = sshll.u32 %s2254_s26, 4  ;;  %s2158_s24 = int_to_ptr.vmem [resolvable:$false] %s2157_s24 }
  0x74   : > { %s2159_s27 = scalar_lea.vmem %s2158_s24, 4096  ;;  %p2160_p6 = scmp.lt.s32.totalorder %s2478_s28, %s2158_s24 }
  0x75   : > { %p2155_p0 = pnand %p2153_p4, %p2139_p5  ;;  %p2161_p12 = scmp.lt.s32.totalorder %s2159_s27, %s2152_s20 }
  0x77   : > { %p2156_p13 = pneg %p2155_p0  ;;  %p2162_p2 = por %p2161_p12, %p2160_p6 }
  0x79   : > { %p2163_p8 = pnand %p2162_p2, %p2156_p13 }
  0x7b   : > { %2166 = shalt.err (!%p2163_p8)
}
  0x7c   : > { %s2894_s4 = smov 8   ;;  %s2895_s1 = smov 128  }
  0x7d   : > { %1937 = dma.hbm_to_vmem [thread:$0]  (!%p2466_p10), %s2483_s23, 2048, %s2478_s28, %s2485_s29, %s2895_s1, %s2895_s1, %s2894_s4  }
  0x7e   : > { %p2896_p5 = scmp.ne.s32.totalorder %s2885_s21, 0 }
  0x7f   : > { %s366_s8 = sand.u32 (!%p2896_p5), 1, %s2231_s13   ;;  %p2897_p3 = scmp.ne.s32.totalorder (!%p2896_p5), %s2883_s25, 0 }
  0x80   : > { %364 = sbr.rel (%p2896_p5) target bundleno = 696 (0x2b8), region = 40  ;;  %s1508_s19 = sshll.u32 (!%p2896_p5), %s366_s8, 7 }
  0x81   : > { %s367_s0 = scalar_lea.sflag (!%p2896_p5), [#allocation7], %s366_s8  ;;  %s2519_s22 = scalar_lea.vmem (!%p2896_p5), [#allocation6], %s1508_s19 }
  0x87   : > { %2206 = dma.done.wait (%p2897_p3), %s367_s0, 2048  }
  0x88   : > { %2208 = vsyncadd (%p2897_p3), %s367_s0, 4294965248  ;;  %s375_s30 = sand.u32 1, %s2219_s10  }
  0x89   : > { %s1509_s20 = sshll.u32 %s375_s30, 7  ;;  %s376_s23 = scalar_lea.sflag [#allocation9], %s375_s30 }
  0x8a   : > { %s2526_s28 = scalar_lea.vmem [#allocation8], %s1509_s20 }
  0x8b   : > { %2210 = dma.done.wait (%p2459_p11), %s376_s23, 2048  }
  0x8c   : > { %2212 = vsyncadd (%p2459_p11), %s376_s23, 4294965248  ;;  %p474_p10 = scmp.lt.s32.totalorder %s2239_s15, 4  ;;  %p489_p9 = scmp.eq.s32.totalorder %s2239_s15, 0 }
  0x8d   : > { %s448_s25 = sld [smem:[#allocation5 + %s2239_s15]]  ;;  %v2255_v0 = vmov (%p489_p9), 0.0  }
  0x8e   : > { %s475_s21 = scalar_select %p474_p10, %s2239_s15, 4 }
  0x8f   : > { %495 = vst [vmem:[#allocation2] sm:$0xff] (%p489_p9), %v2255_v0  ;;  %496 = vst [vmem:[#allocation2 + $0x8] sm:$0xff] (%p489_p9), %v2255_v0 }
  0x90   : > { %s1540_s29 = sshll.u32 %s475_s21, 7  ;;  %497 = vst [vmem:[#allocation2 + $0x10] sm:$0xff] (%p489_p9), %v2255_v0  ;;  %498 = vst [vmem:[#allocation2 + $0x18] sm:$0xff] (%p489_p9), %v2255_v0 }
  0x91   : > { %s2539_s27 = scalar_lea.vmem %s2870_s6, %s1540_s29  ;;  %494 = sbr.rel (!%p489_p9) target bundleno = 152 (0x98), region = 52  ;;  %499 = vst [vmem:[#allocation2 + $0x20] sm:$0xff] (%p489_p9), %v2255_v0  ;;  %500 = vst [vmem:[#allocation2 + $0x28] sm:$0xff] (%p489_p9), %v2255_v0 }
  0x92   : > { %501 = vst [vmem:[#allocation2 + $0x30] sm:$0xff] (%p489_p9), %v2255_v0  ;;  %502 = vst [vmem:[#allocation2 + $0x38] sm:$0xff] (%p489_p9), %v2255_v0 }
  0x93   : > { %p449_p1 = scmp.lt.s32.totalorder %s448_s25, 4  ;;  %503 = vst [vmem:[#allocation2 + $0x40] sm:$0xff] (%p489_p9), %v2255_v0  ;;  %504 = vst [vmem:[#allocation2 + $0x48] sm:$0xff] (%p489_p9), %v2255_v0 }
  0x94   : > { %505 = vst [vmem:[#allocation2 + $0x50] sm:$0xff] (%p489_p9), %v2255_v0  ;;  %506 = vst [vmem:[#allocation2 + $0x58] sm:$0xff] (%p489_p9), %v2255_v0 }
  0x95   : > { %s2919_s25 = smov (!%p449_p1, %s448_s25), 4  ;;  %507 = vst [vmem:[#allocation2 + $0x60] sm:$0xff] (%p489_p9), %v2255_v0  ;;  %508 = vst [vmem:[#allocation2 + $0x68] sm:$0xff] (%p489_p9), %v2255_v0 }
  0x96   : > { %s1539_s4 = sshll.u32 %s2919_s25, 7  ;;  %509 = vst [vmem:[#allocation2 + $0x70] sm:$0xff] (%p489_p9), %v2255_v0  ;;  %510 = vst [vmem:[#allocation2 + $0x78] sm:$0xff] (%p489_p9), %v2255_v0 }
  0x97   : > { %s2544_s8 = scalar_lea.vmem %s2867_s3, %s1539_s4 }
  0x98 PF: > { %s513_s19 = sld [smem:[#allocation4 + %s2239_s15]] }
  0x9e   : > { %p1515_p11 = scmp.le.s32.totalorder %s513_s19, 0 }
  0x9f   : > { %v534_v1 = vld [vmem:[%s2544_s8] sm:$0xff] (!%p1515_p11)  ;;  %v535_v2 = vld [vmem:[%s2544_s8 + $0x8] sm:$0xff] (!%p1515_p11)  ;;  %v536_v3 = vld [vmem:[%s2544_s8 + $0x10] sm:$0xff] (!%p1515_p11)  ;;  %v2256_v6 = vmov (!%p1515_p11), 0  }
  0xa0   : > { %517 = sbr.rel (%p1515_p11) target bundleno = 686 (0x2ae), region = 56  ;;  %v1807_v4 = vpack.c.bf16 (!%p1515_p11), %v535_v2, %v534_v1  ;;  %v537_v5 = vld [vmem:[%s2544_s8 + $0x18] sm:$0xff] (!%p1515_p11)  ;;  %2018 = vset.pattern.permute.xlu1 (!%p1515_p11), %v2256_v6  ;;  %2017 = vset.pattern.permute.xlu0 (!%p1515_p11), %v2256_v6  ;;  %v538_v8 = vld [vmem:[%s2544_s8 + $0x20] sm:$0xff] (!%p1515_p11)  ;;  %v539_v9 = vld [vmem:[%s2544_s8 + $0x28] sm:$0xff] (!%p1515_p11) }
  0xa1   : > { %v1811_v7 = vpack.c.bf16 (!%p1515_p11), %v537_v5, %v536_v3  ;;  %v695_v10 = vld [vmem:[%s2519_s22] sm:$0xff] (!%p1515_p11)  ;;  %v1815_v11 = vpack.c.bf16 (!%p1515_p11), %v539_v9, %v538_v8  ;;  %v540_v12 = vld [vmem:[%s2544_s8 + $0x30] sm:$0xff] (!%p1515_p11)  ;;  %v541_v13 = vld [vmem:[%s2544_s8 + $0x38] sm:$0xff] (!%p1515_p11) }
  0xa2   : > { %1808 = vmatprep.subr.bf16.mxu0 (!%p1515_p11), %v1807_v4  ;;  %v696_v14 = vld [vmem:[%s2519_s22 + $0x8] sm:$0xff] (!%p1515_p11)  ;;  %v518_v16 = vld [vmem:[%s2866_s2] sm:$0xff] (!%p1515_p11)  ;;  %v697_v17 = vld [vmem:[%s2519_s22 + $0x10] sm:$0xff] (!%p1515_p11)  ;;  %v1819_v22 = vpack.c.bf16 (!%p1515_p11), %v541_v13, %v540_v12 }
  0xa3   : > { %1810 = vmatpush3.bf16.msra.mxu0 (!%p1515_p11), %v1807_v4  ;;  %v1839_v15 = vpack.c.bf16 (!%p1515_p11), %v696_v14, %v695_v10  ;;  %v698_v18 = vld [vmem:[%s2519_s22 + $0x18] sm:$0xff] (!%p1515_p11)  ;;  %1671 = vmatprep.mubr.f32.mxu0 (!%p1515_p11), %v518_v16  ;;  %v699_v20 = vld [vmem:[%s2519_s22 + $0x20] sm:$0xff] (!%p1515_p11)  ;;  %v700_v21 = vld [vmem:[%s2519_s22 + $0x28] sm:$0xff] (!%p1515_p11) }
  0xa4   : > { %1812 = vmatprep.subr.bf16.mxu0 (!%p1515_p11), %v1811_v7  ;;  %v1843_v19 = vpack.c.bf16 (!%p1515_p11), %v698_v18, %v697_v17  ;;  %1727 = vmatprep.mubr.f32.mxu1 (!%p1515_p11), %v518_v16  ;;  %v542_v23 = vld [vmem:[%s2544_s8 + $0x40] sm:$0xff] (!%p1515_p11)  ;;  %v543_v24 = vld [vmem:[%s2544_s8 + $0x48] sm:$0xff] (!%p1515_p11)  ;;  %v1847_v25 = vpack.c.bf16 (!%p1515_p11), %v700_v21, %v699_v20  ;;  %v701_v26 = vld [vmem:[%s2519_s22 + $0x30] sm:$0xff] (!%p1515_p11) }
  0xa5   : > { %1840 = vmatprep.subr.bf16.mxu1 (!%p1515_p11), %v1839_v15  ;;  %v702_v27 = vld [vmem:[%s2519_s22 + $0x38] sm:$0xff] (!%p1515_p11)  ;;  %v1823_v28 = vpack.c.bf16 (!%p1515_p11), %v543_v24, %v542_v23  ;;  %v544_v29 = vld [vmem:[%s2544_s8 + $0x50] sm:$0xff] (!%p1515_p11)  ;;  %v703_v32 = vld [vmem:[%s2519_s22 + $0x40] sm:$0xff] (!%p1515_p11) }
  0xa6   : > { %1842 = vmatpush3.bf16.msra.mxu1 (!%p1515_p11), %v1839_v15  ;;  %v545_v30 = vld [vmem:[%s2544_s8 + $0x58] sm:$0xff] (!%p1515_p11)  ;;  %v1851_v31 = vpack.c.bf16 (!%p1515_p11), %v702_v27, %v701_v26  ;;  %v704_v33 = vld [vmem:[%s2519_s22 + $0x48] sm:$0xff] (!%p1515_p11)  ;;  %v984_v35 = vld [vmem:[%s2539_s27] sm:$0xff] (!%p1515_p11) }
  0xa7   : > { %1814 = vmatpush3.bf16.msra.mxu0 %v1811_v7  ;;  %1844 = vmatprep.subr.bf16.mxu1 %v1843_v19  ;;  %v985_v34 = vld [vmem:[%s2539_s27 + $0x8] sm:$0xff]  ;;  %v1827_v36 = vpack.c.bf16 %v545_v30, %v544_v29  ;;  %v546_v37 = vld [vmem:[%s2544_s8 + $0x60] sm:$0xff]  ;;  %v1855_v39 = vpack.c.bf16 %v704_v33, %v703_v32  ;;  %v705_v40 = vld [vmem:[%s2519_s22 + $0x50] sm:$0xff] }
  0xa8   : > { %1816 = vmatprep.subr.bf16.mxu0 %v1815_v11  ;;  %v547_v38 = vld [vmem:[%s2544_s8 + $0x68] sm:$0xff]  ;;  %1007 = vperm.xlu1 %2018, %v985_v34   ;;  %v706_v41 = vld [vmem:[%s2519_s22 + $0x58] sm:$0xff]  ;;  %v992_v43 = vld [vmem:[%s2539_s27 + $0x40] sm:$0xff] }
  0xa9   : > { %1002 = vperm.xlu0 %2017, %v984_v35   ;;  %v993_v42 = vld [vmem:[%s2539_s27 + $0x48] sm:$0xff]  ;;  %v1831_v44 = vpack.c.bf16 %v547_v38, %v546_v37  ;;  %v548_v45 = vld [vmem:[%s2544_s8 + $0x70] sm:$0xff]  ;;  %v549_v46 = vld [vmem:[%s2544_s8 + $0x78] sm:$0xff]  ;;  %v1859_v47 = vpack.c.bf16 %v706_v41, %v705_v40 }
  0xaa   : > { %1846 = vmatpush3.bf16.msra.mxu1 %v1843_v19  ;;  %v707_v48 = vld [vmem:[%s2519_s22 + $0x60] sm:$0xff]  ;;  %v708_v49 = vld [vmem:[%s2519_s22 + $0x68] sm:$0xff]  ;;  %v994_v50 = vld [vmem:[%s2539_s27 + $0x50] sm:$0xff]  ;;  %v1835_v52 = vpack.c.bf16 %v549_v46, %v548_v45 }
  0xab   : > { %1818 = vmatpush3.bf16.msra.mxu0 %v1815_v11  ;;  %1848 = vmatprep.subr.bf16.mxu1 %v1847_v25  ;;  %v986_v51 = vld [vmem:[%s2539_s27 + $0x10] sm:$0xff]  ;;  %v1863_v53 = vpack.c.bf16 %v708_v49, %v707_v48  ;;  %v710_v55 = vld [vmem:[%s2519_s22 + $0x78] sm:$0xff]  ;;  %v996_v59 = vld [vmem:[%s2539_s27 + $0x60] sm:$0xff] }
  0xac   : > { %1820 = vmatprep.subr.bf16.mxu0 %v1819_v22  ;;  %1047 = vperm.xlu1 %2018, %v993_v42   ;;  %v709_v54 = vld [vmem:[%s2519_s22 + $0x70] sm:$0xff]  ;;  %v995_v56 = vld [vmem:[%s2539_s27 + $0x58] sm:$0xff]  ;;  %v519_v60 = vld [vmem:[%s2866_s2 + $0x8] sm:$0xff] }
  0xad   : > { %1042 = vperm.xlu0 %2017, %v992_v43   ;;  %v987_v57 = vld [vmem:[%s2539_s27 + $0x18] sm:$0xff]  ;;  %v1867_v58 = vpack.c.bf16 %v710_v55, %v709_v54  ;;  %v988_v61 = vld [vmem:[%s2539_s27 + $0x20] sm:$0xff]  ;;  %v520_v62 = vld [vmem:[%s2866_s2 + $0x10] sm:$0xff] }
  0xae   : > { %1850 = vmatpush3.bf16.msra.mxu1 %v1847_v25  ;;  %v997_v63 = vld [vmem:[%s2539_s27 + $0x68] sm:$0xff]  ;;  %v521_v0 = vld [vmem:[%s2866_s2 + $0x18] sm:$0xff]  ;;  %v522_v2 = vld [vmem:[%s2866_s2 + $0x20] sm:$0xff] }
  0xaf   : > { %1822 = vmatpush3.bf16.msra.mxu0 %v1819_v22  ;;  %1852 = vmatprep.subr.bf16.mxu1 %v1851_v31  ;;  %v989_v1 = vld [vmem:[%s2539_s27 + $0x28] sm:$0xff]  ;;  %v998_v3 = vld [vmem:[%s2539_s27 + $0x70] sm:$0xff]  ;;  %v999_v7 = vld [vmem:[%s2539_s27 + $0x78] sm:$0xff] }
  0xb0   : > { %1824 = vmatprep.subr.bf16.mxu0 %v1823_v28  ;;  %1052 = vperm.xlu1 %2018, %v994_v50   ;;  %v523_v4 = vld [vmem:[%s2866_s2 + $0x28] sm:$0xff]  ;;  %v990_v5 = vld [vmem:[%s2539_s27 + $0x30] sm:$0xff]  ;;  %v525_v8 = vld [vmem:[%s2866_s2 + $0x38] sm:$0xff] }
  0xb1   : > { %1012 = vperm.xlu0 %2017, %v986_v51   ;;  %v524_v6 = vld [vmem:[%s2866_s2 + $0x30] sm:$0xff]  ;;  %v991_v9 = vld [vmem:[%s2539_s27 + $0x38] sm:$0xff]  ;;  %v526_v10 = vld [vmem:[%s2866_s2 + $0x40] sm:$0xff] }
  0xb2   : > { %1854 = vmatpush3.bf16.msra.mxu1 %v1851_v31  ;;  %v527_v11 = vld [vmem:[%s2866_s2 + $0x48] sm:$0xff]  ;;  %v528_v12 = vld [vmem:[%s2866_s2 + $0x50] sm:$0xff]  ;;  %v529_v13 = vld [vmem:[%s2866_s2 + $0x58] sm:$0xff] }
  0xb3   : > { %1826 = vmatpush3.bf16.msra.mxu0 %v1823_v28  ;;  %1856 = vmatprep.subr.bf16.mxu1 %v1855_v39  ;;  %v530_v14 = vld [vmem:[%s2866_s2 + $0x60] sm:$0xff]  ;;  %v531_v15 = vld [vmem:[%s2866_s2 + $0x68] sm:$0xff]  ;;  %v532_v16 = vld [vmem:[%s2866_s2 + $0x70] sm:$0xff] }
  0xb4   : > { %1828 = vmatprep.subr.bf16.mxu0 %v1827_v36  ;;  %1057 = vperm.xlu1 %2018, %v995_v56   ;;  %v533_v17 = vld [vmem:[%s2866_s2 + $0x78] sm:$0xff]  ;;  %v1112_v18 = vld [vmem:[%s2526_s28] sm:$0xff]  ;;  %v1113_v19 = vld [vmem:[%s2526_s28 + $0x8] sm:$0xff] }
  0xb5   : > { %1017 = vperm.xlu0 %2017, %v987_v57   ;;  %v1871_v20 = vpack.c.bf16 %v1113_v19, %v1112_v18  ;;  %v1114_v21 = vld [vmem:[%s2526_s28 + $0x10] sm:$0xff]  ;;  %v1115_v22 = vld [vmem:[%s2526_s28 + $0x18] sm:$0xff]  ;;  %v1116_v24 = vld [vmem:[%s2526_s28 + $0x20] sm:$0xff] }
  0xb6   : > { %1858 = vmatpush3.bf16.msra.mxu1 %v1855_v39  ;;  %v1875_v23 = vpack.c.bf16 %v1115_v22, %v1114_v21  ;;  %v1117_v25 = vld [vmem:[%s2526_s28 + $0x28] sm:$0xff]  ;;  %v1118_v27 = vld [vmem:[%s2526_s28 + $0x30] sm:$0xff]  ;;  %v1119_v28 = vld [vmem:[%s2526_s28 + $0x38] sm:$0xff] }
  0xb7   : > { %1830 = vmatpush3.bf16.msra.mxu0 %v1827_v36  ;;  %1860 = vmatprep.subr.bf16.mxu1 %v1859_v47  ;;  %v1879_v26 = vpack.c.bf16 %v1117_v25, %v1116_v24  ;;  %v1883_v29 = vpack.c.bf16 %v1119_v28, %v1118_v27  ;;  %v1120_v30 = vld [vmem:[%s2526_s28 + $0x40] sm:$0xff]  ;;  %v1121_v31 = vld [vmem:[%s2526_s28 + $0x48] sm:$0xff]  ;;  %v1122_v33 = vld [vmem:[%s2526_s28 + $0x50] sm:$0xff] }
  0xb8   : > { %1832 = vmatprep.subr.bf16.mxu0 %v1831_v44  ;;  %1062 = vperm.xlu1 %2018, %v996_v59   ;;  %v1887_v32 = vpack.c.bf16 %v1121_v31, %v1120_v30  ;;  %v1123_v34 = vld [vmem:[%s2526_s28 + $0x58] sm:$0xff]  ;;  %v1124_v36 = vld [vmem:[%s2526_s28 + $0x60] sm:$0xff]  ;;  %v1125_v37 = vld [vmem:[%s2526_s28 + $0x68] sm:$0xff] }
  0xb9   : > { %1022 = vperm.xlu0 %2017, %v988_v61   ;;  %v1891_v35 = vpack.c.bf16 %v1123_v34, %v1122_v33  ;;  %v1895_v38 = vpack.c.bf16 %v1125_v37, %v1124_v36  ;;  %v1126_v39 = vld [vmem:[%s2526_s28 + $0x70] sm:$0xff]  ;;  %v1127_v40 = vld [vmem:[%s2526_s28 + $0x78] sm:$0xff] }
  0xba   : > { %1862 = vmatpush3.bf16.msra.mxu1 %v1859_v47  ;;  %v1899_v41 = vpack.c.bf16 %v1127_v40, %v1126_v39 }
  0xbb   : > { %1834 = vmatpush3.bf16.msra.mxu0 %v1831_v44  ;;  %1864 = vmatprep.subr.bf16.mxu1 %v1863_v53 }
  0xbc   : > { %1836 = vmatprep.subr.bf16.mxu0 %v1835_v52  ;;  %1067 = vperm.xlu1 %2018, %v997_v63  }
  0xbd   : > { %1027 = vperm.xlu0 %2017, %v989_v1  }
  0xbe   : > { %1866 = vmatpush3.bf16.msra.mxu1 %v1863_v53 }
  0xbf   : > { %1838 = vmatpush3.bf16.msra.mxu0 %v1835_v52  ;;  %1868 = vmatprep.subr.bf16.mxu1 %v1867_v58 }
  0xc0   : > { %1072 = vperm.xlu1 %2018, %v998_v3   ;;  %1872 = vmatprep.subr.bf16.mxu0 %v1871_v20 }
  0xc1   : > { %1032 = vperm.xlu0 %2017, %v990_v5  }
  0xc2   : > { %1672 = vmatmul.mubr.f32.vlgmr.msra.gmra.mrb[0].mxu0 %v519_v60  ;;  %1870 = vmatpush3.bf16.msra.mxu1 %v1867_v58 }
  0xc3   : > { %1674 = vmatprep.mubr.f32.mxu0 %v520_v62  ;;  %1903 = vmatprep.subr.bf16.mxu1 %v1871_v20 }
  0xc4   : > { %1077 = vperm.xlu1 %2018, %v999_v7   ;;  %1874 = vmatpush3.bf16.msra.mxu0 %v1871_v20 }
  0xc5   : > { %1728 = vmatmul.mubr.f32.vlgmr.msra.gmra.mrb[0].mxu1 %v519_v60  ;;  %1037 = vperm.xlu0 %2017, %v991_v9  }
  0xc6   : > { %1675 = vmatmul.mubr.f32.gmra.mrb[2].mxu0 %v521_v0  ;;  %1730 = vmatprep.mubr.f32.mxu1 %v520_v62 }
  0xc7   : > { %1677 = vmatprep.mubr.f32.mxu0 %v522_v2  ;;  %1911 = vmatpush3.bf16.msra.mxu1 %v1871_v20 }
  0xc8   : > { %1876 = vmatprep.subr.bf16.mxu0 %v1875_v23  ;;  %1904 = vmatprep.subr.bf16.mxu1 %v1875_v23 }
  0xc9   : > { %1731 = vmatmul.mubr.f32.gmra.mrb[2].mxu1 %v521_v0  ;;  %1878 = vmatpush3.bf16.msra.mxu0 %v1875_v23 }
  0xca   : > { %1678 = vmatmul.mubr.f32.gmra.mrb[4].mxu0 %v523_v4  ;;  %1733 = vmatprep.mubr.f32.mxu1 %v522_v2 }
  0xcb   : > { %1680 = vmatprep.mubr.f32.mxu0 %v524_v6  ;;  %1912 = vmatpush3.bf16.msra.mxu1 %v1875_v23 }
  0xcc   : > { %1880 = vmatprep.subr.bf16.mxu0 %v1879_v26  ;;  %1905 = vmatprep.subr.bf16.mxu1 %v1879_v26 }
  0xcd   : > { %1734 = vmatmul.mubr.f32.gmra.mrb[4].mxu1 %v523_v4  ;;  %1882 = vmatpush3.bf16.msra.mxu0 %v1879_v26 }
  0xce   : > { %1681 = vmatmul.mubr.f32.gmra.mrb[6].mxu0 %v525_v8  ;;  %1736 = vmatprep.mubr.f32.mxu1 %v524_v6 }
  0xcf   : > { %1683 = vmatprep.mubr.f32.mxu0 %v526_v10  ;;  %1913 = vmatpush3.bf16.msra.mxu1 %v1879_v26 }
  0xd0   : > { %1884 = vmatprep.subr.bf16.mxu0 %v1883_v29  ;;  %1906 = vmatprep.subr.bf16.mxu1 %v1883_v29 }
  0xd1   : > { %1737 = vmatmul.mubr.f32.gmra.mrb[6].mxu1 %v525_v8  ;;  %1886 = vmatpush3.bf16.msra.mxu0 %v1883_v29 }
  0xd2   : > { %1684 = vmatmul.mubr.f32.gmra.mrb[8].mxu0 %v527_v11  ;;  %1739 = vmatprep.mubr.f32.mxu1 %v526_v10 }
  0xd3   : > { %1686 = vmatprep.mubr.f32.mxu0 %v528_v12  ;;  %1914 = vmatpush3.bf16.msra.mxu1 %v1883_v29 }
  0xd4   : > { %1888 = vmatprep.subr.bf16.mxu0 %v1887_v32  ;;  %1907 = vmatprep.subr.bf16.mxu1 %v1887_v32 }
  0xd5   : > { %1740 = vmatmul.mubr.f32.gmra.mrb[8].mxu1 %v527_v11  ;;  %1890 = vmatpush3.bf16.msra.mxu0 %v1887_v32 }
  0xd6   : > { %1687 = vmatmul.mubr.f32.gmra.mrb[10].mxu0 %v529_v13  ;;  %1742 = vmatprep.mubr.f32.mxu1 %v528_v12 }
  0xd7   : > { %1689 = vmatprep.mubr.f32.mxu0 %v530_v14  ;;  %1915 = vmatpush3.bf16.msra.mxu1 %v1887_v32 }
  0xd8   : > { %1892 = vmatprep.subr.bf16.mxu0 %v1891_v35  ;;  %1908 = vmatprep.subr.bf16.mxu1 %v1891_v35 }
  0xd9   : > { %1743 = vmatmul.mubr.f32.gmra.mrb[10].mxu1 %v529_v13  ;;  %1894 = vmatpush3.bf16.msra.mxu0 %v1891_v35 }
  0xda   : > { %1690 = vmatmul.mubr.f32.gmra.mrb[12].mxu0 %v531_v15  ;;  %1745 = vmatprep.mubr.f32.mxu1 %v530_v14 }
  0xdb   : > { %1692 = vmatprep.mubr.f32.mxu0 %v532_v16  ;;  %1916 = vmatpush3.bf16.msra.mxu1 %v1891_v35 }
  0xdc   : > { %1896 = vmatprep.subr.bf16.mxu0 %v1895_v38  ;;  %1909 = vmatprep.subr.bf16.mxu1 %v1895_v38 }
  0xdd   : > { %1746 = vmatmul.mubr.f32.gmra.mrb[12].mxu1 %v531_v15  ;;  %1898 = vmatpush3.bf16.msra.mxu0 %v1895_v38 }
  0xde   : > { %1693 = vmatmul.mubr.f32.gmra.mrb[14].mxu0 %v533_v17  ;;  %1748 = vmatprep.mubr.f32.mxu1 %v532_v16 }
  0xdf   : > { %1917 = vmatpush3.bf16.msra.mxu1 %v1895_v38  ;;  %1900 = vmatprep.subr.bf16.mxu0 %v1899_v41 }
  0xe0   : > { %1910 = vmatprep.subr.bf16.mxu1 %v1899_v41 }
  0xe1   : > { %1749 = vmatmul.mubr.f32.gmra.mrb[14].mxu1 %v533_v17  ;;  %1902 = vmatpush3.bf16.msra.mxu0 %v1899_v41 }
  0xe3   : > { %1918 = vmatpush3.bf16.msra.mxu1 %v1899_v41 }
 0x127   : > { %v1008_v17 = vpop.permute.xlu1 %1007 }
 0x128   : > { %v2665_v46 = vpop.permute.xlu0 %1002 }
 0x12b   : > { %v2730_v35 = vpop.permute.xlu1 %1047 }
 0x12c   : > { %v2684_v57 = vpop.permute.xlu0 %1042 }
 0x130   : > { %v2699_v6 = vpop.permute.xlu0 %1012 }
 0x134   : > { %v2718_v25 = vpop.permute.xlu0 %1017 }
 0x195   : > { %v2659_v42 = vpop.f32.mrb[0].mxu0 }
 0x196   : > { %v1517_v43 = vmul.f32 -1.442695, %v2659_v42  ;;  %v2662_v44 = vpop.f32.mrb[1].mxu0 }
 0x197   : > { %v1516_v45 = vmul.f32 -1.442695, %v2662_v44 }
 0x198   : > { %2019 = vpow2.f32 %v1517_v43  ;;  %v2672_v50 = vpop.f32.mrb[0].mxu1 }
 0x199   : > { %2021 = vpow2.f32 %v1516_v45  ;;  %v2667_v47 = vpop.f32.mrb[2].mxu0  ;;  %v2675_v52 = vpop.f32.mrb[1].mxu1 }
 0x19a   : > { %v1519_v48 = vmul.f32 -1.442695, %v2667_v47  ;;  %v2670_v49 = vpop.f32.mrb[3].mxu0  ;;  %v1023_v45 = vpop.permute.xlu0 %1022 }
 0x19b   : > { %v1518_v51 = vmul.f32 -1.442695, %v2670_v49 }
 0x19c   : > { %2023 = vpow2.f32 %v1519_v48  ;;  %v2682_v56 = vpop.f32.mrb[2].mxu1 }
 0x19d   : > { %2025 = vpow2.f32 %v1518_v51  ;;  %v2677_v53 = vpop.f32.mrb[4].mxu0  ;;  %v2687_v59 = vpop.f32.mrb[3].mxu1 }
 0x19e   : > { %v1521_v54 = vmul.f32 -1.442695, %v2677_v53  ;;  %v2680_v55 = vpop.f32.mrb[5].mxu0 }
 0x19f   : > { %v1520_v58 = vmul.f32 -1.442695, %v2680_v55 }
 0x1a0   : > { %2027 = vpow2.f32 %v1521_v54  ;;  %v2694_v0 = vpop.f32.mrb[4].mxu1 }
 0x1a1   : > { %2029 = vpow2.f32 %v1520_v58  ;;  %v2689_v60 = vpop.f32.mrb[6].mxu0  ;;  %v2697_v4 = vpop.f32.mrb[5].mxu1 }
 0x1a2   : > { %v2020_v61 = vpop.eup %2019  ;;  %v1523_v62 = vmul.f32 -1.442695, %v2689_v60  ;;  %v2692_v63 = vpop.f32.mrb[7].mxu0 }
 0x1a3   : > { %v2022_v1 = vpop.eup %2021  ;;  %v905_v2 = vadd.f32 1.0, %v2020_v61  ;;  %v1522_v3 = vmul.f32 -1.442695, %v2692_v63 }
 0x1a4   : > { %v904_v5 = vadd.f32 1.0, %v2022_v1  ;;  %2031 = vpow2.f32 %v1523_v62  ;;  %v2706_v11 = vpop.f32.mrb[6].mxu1 }
 0x1a5   : > { %2033 = vrcp.f32 %v905_v2  ;;  %v2701_v7 = vpop.f32.mrb[8].mxu0  ;;  %v2709_v15 = vpop.f32.mrb[7].mxu1 }
 0x1a6   : > { %v2024_v8 = vpop.eup %2023  ;;  %2035 = vrcp.f32 %v904_v5  ;;  %v1525_v9 = vmul.f32 -1.442695, %v2701_v7  ;;  %v2704_v10 = vpop.f32.mrb[9].mxu0 }
 0x1a7   : > { %v2026_v12 = vpop.eup %2025  ;;  %v907_v13 = vadd.f32 1.0, %v2024_v8  ;;  %2037 = vpow2.f32 %v1522_v3  ;;  %v1524_v14 = vmul.f32 -1.442695, %v2704_v10 }
 0x1a8   : > { %v906_v16 = vadd.f32 1.0, %v2026_v12  ;;  %2039 = vpow2.f32 %v1525_v9  ;;  %v2716_v22 = vpop.f32.mrb[8].mxu1 }
 0x1a9   : > { %2041 = vrcp.f32 %v907_v13  ;;  %v2711_v18 = vpop.f32.mrb[10].mxu0  ;;  %v2721_v27 = vpop.f32.mrb[9].mxu1 }
 0x1aa   : > { %v2028_v19 = vpop.eup %2027  ;;  %2043 = vrcp.f32 %v906_v16  ;;  %v1527_v20 = vmul.f32 -1.442695, %v2711_v18  ;;  %v2714_v21 = vpop.f32.mrb[11].mxu0 }
 0x1ab   : > { %v2030_v23 = vpop.eup %2029  ;;  %v909_v24 = vadd.f32 1.0, %v2028_v19  ;;  %2045 = vpow2.f32 %v1524_v14  ;;  %v1526_v26 = vmul.f32 -1.442695, %v2714_v21  ;;  %v2751_v13 = vpop.permute.xlu1 %1052 }
 0x1ac   : > { %v908_v28 = vadd.f32 1.0, %v2030_v23  ;;  %2047 = vpow2.f32 %v1527_v20  ;;  %v2728_v33 = vpop.f32.mrb[10].mxu1 }
 0x1ad   : > { %2049 = vrcp.f32 %v909_v24  ;;  %v2723_v29 = vpop.f32.mrb[12].mxu0  ;;  %v2733_v38 = vpop.f32.mrb[11].mxu1 }
 0x1ae   : > { %v2032_v30 = vpop.eup %2031  ;;  %2051 = vrcp.f32 %v908_v28  ;;  %v1529_v31 = vmul.f32 -1.442695, %v2723_v29  ;;  %v2726_v32 = vpop.f32.mrb[13].mxu0 }
 0x1af   : > { %v2034_v34 = vpop.eup %2033  ;;  %v911_v36 = vadd.f32 1.0, %v2032_v30  ;;  %2053 = vpow2.f32 %v1526_v26  ;;  %v1528_v37 = vmul.f32 -1.442695, %v2726_v32 }
 0x1b0   : > { %v2036_v39 = vpop.eup %2035  ;;  %v953_v40 = vmul.f32 %v2034_v34, %v2659_v42  ;;  %2055 = vpow2.f32 %v1529_v31  ;;  %v2743_v1 = vpop.f32.mrb[12].mxu1 }
 0x1b1   : > { %v2038_v41 = vpop.eup %2037  ;;  %v952_v43 = vmul.f32 %v2036_v39, %v2662_v44  ;;  %2057 = vrcp.f32 %v911_v36  ;;  %v2737_v48 = vpop.f32.mrb[14].mxu0 }
 0x1b2   : > { %v2040_v51 = vpop.eup %2039  ;;  %v910_v54 = vadd.f32 1.0, %v2038_v41  ;;  %2059 = vpow2.f32 %v1528_v37  ;;  %v969_v58 = vmul.f32 %v2672_v50, %v953_v40  ;;  %v1531_v61 = vmul.f32 -1.442695, %v2737_v48  ;;  %v2741_v62 = vpop.f32.mrb[15].mxu0 }
 0x1b3   : > { %v2042_v42 = vpop.eup %2041  ;;  %v913_v2 = vadd.f32 1.0, %v2040_v51  ;;  %v968_v3 = vmul.f32 %v952_v43, %v2675_v52  ;;  %v1530_v44 = vmul.f32 -1.442695, %v2741_v62  ;;  %v2747_v5 = vpop.f32.mrb[13].mxu1 }
 0x1b4   : > { %v2044_v8 = vpop.eup %2043  ;;  %v955_v9 = vmul.f32 %v2042_v42, %v2667_v47  ;;  %2061 = vrcp.f32 %v910_v54  ;;  %v1081_v20 = vmul.f32 %v1008_v17, %v969_v58  ;;  %v2755_v23 = vpop.f32.mrb[14].mxu1 }
 0x1b5   : > { %v2046_v12 = vpop.eup %2045  ;;  %v954_v50 = vmul.f32 %v2044_v8, %v2670_v49  ;;  %2063 = vrcp.f32 %v913_v2  ;;  %v1080_v14 = vmul.f32 %v2665_v46, %v968_v3  ;;  %v1028_v47 = vpop.permute.xlu0 %1027 }
 0x1b6   : > { %v2048_v16 = vpop.eup %2047  ;;  %v912_v19 = vadd.f32 1.0, %v2046_v12  ;;  %2065 = vpow2.f32 %v1531_v61  ;;  %v971_v52 = vmul.f32 %v2682_v56, %v955_v9  ;;  %v2758_v49 = vpop.f32.mrb[15].mxu1 }
 0x1b7   : > { %v2050_v24 = vpop.eup %2049  ;;  %v915_v26 = vadd.f32 1.0, %v2048_v16  ;;  %2067 = vpow2.f32 %v1530_v44  ;;  %v970_v28 = vmul.f32 %v954_v50, %v2687_v59  ;;  %1783 = vmatprep.mubr.f32.mxu0 %v1080_v14  ;;  %v1058_v40 = vpop.permute.xlu1 %1057 }
 0x1b8   : > { %v2052_v30 = vpop.eup %2051  ;;  %v957_v46 = vmul.f32 %v2050_v24, %v2677_v53  ;;  %2069 = vrcp.f32 %v912_v19  ;;  %1784 = vmatmul.mubr.f32.vlgmr.msra.gmra.mrb[16].mxu0 %v1081_v20  ;;  %v1083_v37 = vmul.f32 %v2718_v25, %v971_v52 }
 0x1b9   : > { %v2054_v17 = vpop.eup %2053  ;;  %v956_v31 = vmul.f32 %v2052_v30, %v2680_v55  ;;  %2071 = vrcp.f32 %v915_v26  ;;  %v1082_v56 = vmul.f32 %v2699_v6, %v970_v28  ;;  %v1033_v6 = vpop.permute.xlu0 %1032 }
 0x1ba   : > { %v2056_v34 = vpop.eup %2055  ;;  %v914_v36 = vadd.f32 1.0, %v2054_v17  ;;  %v973_v59 = vmul.f32 %v2694_v0, %v957_v46 }
 0x1bb   : > { %v2058_v39 = vpop.eup %2057  ;;  %v917_v41 = vadd.f32 1.0, %v2056_v34  ;;  %v972_v43 = vmul.f32 %v956_v31, %v2697_v4  ;;  %1786 = vmatprep.mubr.f32.mxu0 %v1082_v56  ;;  %v1063_v3 = vpop.permute.xlu1 %1062 }
 0x1bc   : > { %v2060_v53 = vpop.eup %2059  ;;  %v959_v51 = vmul.f32 %v2058_v39, %v2689_v60  ;;  %2073 = vrcp.f32 %v914_v36  ;;  %1787 = vmatmul.mubr.f32.gmra.mrb[18].mxu0 %v1083_v37  ;;  %v1085_v61 = vmul.f32 %v1028_v47, %v973_v59  ;;  %v1097_v36 = vld [vmem:[#allocation2 + $0x8] sm:$0xff]  ;;  %v1096_v37 = vld [vmem:[#allocation2] sm:$0xff] }
 0x1bd   : > { %2075 = vrcp.f32 %v917_v41  ;;  %v916_v55 = vadd.f32 1.0, %v2060_v53  ;;  %v1084_v54 = vmul.f32 %v1023_v45, %v972_v43  ;;  %v1099_v41 = vld [vmem:[#allocation2 + $0x18] sm:$0xff] }
 0x1be   : > { %v2062_v58 = vpop.eup %2061  ;;  %v975_v25 = vmul.f32 %v2706_v11, %v959_v51  ;;  %v1101_v51 = vld [vmem:[#allocation2 + $0x28] sm:$0xff] }
 0x1bf   : > { %v2064_v0 = vpop.eup %2063  ;;  %v958_v42 = vmul.f32 %v2062_v58, %v2692_v63  ;;  %2077 = vrcp.f32 %v916_v55  ;;  %1789 = vmatprep.mubr.f32.mxu0 %v1084_v54  ;;  %v1038_v63 = vpop.permute.xlu0 %1037  ;;  %v1100_v55 = vld [vmem:[#allocation2 + $0x20] sm:$0xff] }
 0x1c0   : > { %v2066_v4 = vpop.eup %2065  ;;  %v961_v2 = vmul.f32 %v2064_v0, %v2701_v7  ;;  %1790 = vmatmul.mubr.f32.gmra.mrb[20].mxu0 %v1085_v61  ;;  %v1087_v7 = vmul.f32 %v1038_v63, %v975_v25  ;;  %v1068_v24 = vpop.permute.xlu1 %1067  ;;  %v1103_v25 = vld [vmem:[#allocation2 + $0x38] sm:$0xff]  ;;  %v1102_v0 = vld [vmem:[#allocation2 + $0x30] sm:$0xff] }
 0x1c1   : > { %v2068_v60 = vpop.eup %2067  ;;  %v919_v44 = vadd.f32 1.0, %v2066_v4  ;;  %v974_v8 = vmul.f32 %v958_v42, %v2709_v15 }
 0x1c2   : > { %v2070_v9 = vpop.eup %2069  ;;  %v918_v45 = vadd.f32 1.0, %v2068_v60  ;;  %v977_v12 = vmul.f32 %v2716_v22, %v961_v2 }
 0x1c3   : > { %v2072_v50 = vpop.eup %2071  ;;  %v960_v11 = vmul.f32 %v2070_v9, %v2704_v10  ;;  %2079 = vrcp.f32 %v919_v44  ;;  %v1086_v14 = vmul.f32 %v1033_v6, %v974_v8  ;;  %v1104_v44 = vld [vmem:[#allocation2 + $0x40] sm:$0xff] }
 0x1c4   : > { %v963_v16 = vmul.f32 %v2072_v50, %v2711_v18  ;;  %2081 = vrcp.f32 %v918_v45  ;;  %v1089_v47 = vmul.f32 %v2730_v35, %v977_v12  ;;  %v1107_v50 = vld [vmem:[#allocation2 + $0x58] sm:$0xff] }
 0x1c5   : > { %v976_v19 = vmul.f32 %v960_v11, %v2721_v27  ;;  %1792 = vmatprep.mubr.f32.mxu0 %v1086_v14  ;;  %v1106_v11 = vld [vmem:[#allocation2 + $0x50] sm:$0xff] }
 0x1c6   : > { %v2074_v20 = vpop.eup %2073  ;;  %v979_v15 = vmul.f32 %v2728_v33, %v963_v16  ;;  %1793 = vmatmul.mubr.f32.gmra.mrb[22].mxu0 %v1087_v7 }
 0x1c7   : > { %v2076_v52 = vpop.eup %2075  ;;  %v962_v22 = vmul.f32 %v2074_v20, %v2714_v21  ;;  %v1088_v10 = vmul.f32 %v2684_v57, %v976_v19  ;;  %v1073_v57 = vpop.permute.xlu1 %1072  ;;  %v1109_v19 = vld [vmem:[#allocation2 + $0x68] sm:$0xff]  ;;  %v1108_v20 = vld [vmem:[#allocation2 + $0x60] sm:$0xff] }
 0x1c8   : > { %v965_v26 = vmul.f32 %v2076_v52, %v2723_v29  ;;  %v1091_v46 = vmul.f32 %v1058_v40, %v979_v15 }
 0x1c9   : > { %v2078_v18 = vpop.eup %2077  ;;  %v978_v28 = vmul.f32 %v962_v22, %v2733_v38  ;;  %1795 = vmatprep.mubr.f32.mxu1 %v1088_v10  ;;  %v1111_v10 = vld [vmem:[#allocation2 + $0x78] sm:$0xff] }
 0x1ca   : > { %v964_v27 = vmul.f32 %v2078_v18, %v2726_v32  ;;  %v981_v30 = vmul.f32 %v2743_v1, %v965_v26  ;;  %1796 = vmatmul.mubr.f32.vlgmr.msra.gmra.mrb[16].mxu1 %v1089_v47  ;;  %v1110_v26 = vld [vmem:[#allocation2 + $0x70] sm:$0xff] }
 0x1cb   : > { %v1090_v33 = vmul.f32 %v2751_v13, %v978_v28  ;;  %v1078_v13 = vpop.permute.xlu1 %1077 }
 0x1cc   : > { %v980_v21 = vmul.f32 %v964_v27, %v2747_v5  ;;  %v1093_v56 = vmul.f32 %v1068_v24, %v981_v30 }
 0x1cd   : > { %v2080_v17 = vpop.eup %2079  ;;  %1798 = vmatprep.mubr.f32.mxu1 %v1090_v33 }
 0x1ce   : > { %v2082_v29 = vpop.eup %2081  ;;  %v967_v35 = vmul.f32 %v2080_v17, %v2737_v48  ;;  %v1092_v31 = vmul.f32 %v1063_v3, %v980_v21  ;;  %1799 = vmatmul.mubr.f32.gmra.mrb[18].mxu1 %v1091_v46  ;;  %v1105_v3 = vld [vmem:[#allocation2 + $0x48] sm:$0xff] }
 0x1cf   : > { %v966_v38 = vmul.f32 %v2082_v29, %v2741_v62  ;;  %v1098_v62 = vld [vmem:[#allocation2 + $0x10] sm:$0xff] }
 0x1d0   : > { %v983_v32 = vmul.f32 %v2755_v23, %v967_v35  ;;  %1801 = vmatprep.mubr.f32.mxu1 %v1092_v31 }
 0x1d1   : > { %v982_v1 = vmul.f32 %v966_v38, %v2758_v49 }
 0x1d2   : > { %1802 = vmatmul.mubr.f32.gmra.mrb[20].mxu1 %v1093_v56  ;;  %v1095_v5 = vmul.f32 %v1078_v13, %v983_v32 }
 0x1d3   : > { %v1094_v34 = vmul.f32 %v1073_v57, %v982_v1 }
 0x1d5   : > { %1804 = vmatprep.mubr.f32.mxu1 %v1094_v34 }
 0x1d6   : > { %1805 = vmatmul.mubr.f32.gmra.mrb[22].mxu1 %v1095_v5 }
 0x28b   : > { %v1785_v59 = vpop.f32.mrb[16].mxu0 }
 0x28c   : > { %v1274_v48 = vadd.f32 %v1785_v59, %v1097_v36  ;;  %v1194_v39 = vpop.f32.mrb[17].mxu0 }
 0x28d   : > { %v1273_v40 = vadd.f32 %v1194_v39, %v1096_v37 }
 0x28e   : > { %1290 = vst [vmem:[#allocation2 + $0x8] sm:$0xff] %v1274_v48 }
 0x28f   : > { %1289 = vst [vmem:[#allocation2] sm:$0xff] %v1273_v40  ;;  %v1788_v23 = vpop.f32.mrb[18].mxu0 }
 0x290   : > { %v1276_v43 = vadd.f32 %v1788_v23, %v1099_v41  ;;  %v1204_v53 = vpop.f32.mrb[19].mxu0 }
 0x291   : > { %v1275_v49 = vadd.f32 %v1204_v53, %v1098_v62 }
 0x292   : > { %1292 = vst [vmem:[#allocation2 + $0x18] sm:$0xff] %v1276_v43 }
 0x293   : > { %1291 = vst [vmem:[#allocation2 + $0x10] sm:$0xff] %v1275_v49  ;;  %v1791_v6 = vpop.f32.mrb[20].mxu0 }
 0x294   : > { %v1278_v54 = vadd.f32 %v1791_v6, %v1101_v51  ;;  %v1214_v58 = vpop.f32.mrb[21].mxu0 }
 0x295   : > { %v1277_v61 = vadd.f32 %v1214_v58, %v1100_v55 }
 0x296   : > { %1294 = vst [vmem:[#allocation2 + $0x28] sm:$0xff] %v1278_v54 }
 0x297   : > { %1293 = vst [vmem:[#allocation2 + $0x20] sm:$0xff] %v1277_v61 }
 0x299   : > { %v1794_v42 = vpop.f32.mrb[22].mxu0 }
 0x29a   : > { %v1280_v4 = vadd.f32 %v1794_v42, %v1103_v25  ;;  %v1224_v2 = vpop.f32.mrb[23].mxu0 }
 0x29b   : > { %v1279_v60 = vadd.f32 %v1224_v2, %v1102_v0 }
 0x29c   : > { %1296 = vst [vmem:[#allocation2 + $0x38] sm:$0xff] %v1280_v4 }
 0x29d   : > { %1295 = vst [vmem:[#allocation2 + $0x30] sm:$0xff] %v1279_v60  ;;  %v1797_v8 = vpop.f32.mrb[16].mxu1 }
 0x29e   : > { %v1282_v9 = vadd.f32 %v1797_v8, %v1105_v3  ;;  %v1234_v45 = vpop.f32.mrb[17].mxu1 }
 0x29f   : > { %v1281_v12 = vadd.f32 %v1234_v45, %v1104_v44 }
 0x2a0   : > { %1298 = vst [vmem:[#allocation2 + $0x48] sm:$0xff] %v1282_v9 }
 0x2a1   : > { %1297 = vst [vmem:[#allocation2 + $0x40] sm:$0xff] %v1281_v12  ;;  %v1800_v63 = vpop.f32.mrb[18].mxu1 }
 0x2a2   : > { %v1284_v14 = vadd.f32 %v1800_v63, %v1107_v50  ;;  %v1244_v16 = vpop.f32.mrb[19].mxu1 }
 0x2a3   : > { %v1283_v7 = vadd.f32 %v1244_v16, %v1106_v11 }
 0x2a4   : > { %1300 = vst [vmem:[#allocation2 + $0x58] sm:$0xff] %v1284_v14 }
 0x2a5   : > { %1299 = vst [vmem:[#allocation2 + $0x50] sm:$0xff] %v1283_v7  ;;  %v1803_v15 = vpop.f32.mrb[20].mxu1 }
 0x2a6   : > { %v1286_v52 = vadd.f32 %v1803_v15, %v1109_v19  ;;  %v1254_v22 = vpop.f32.mrb[21].mxu1 }
 0x2a7   : > { %v1285_v24 = vadd.f32 %v1254_v22, %v1108_v20 }
 0x2a8   : > { %1302 = vst [vmem:[#allocation2 + $0x68] sm:$0xff] %v1286_v52 }
 0x2a9   : > { %1301 = vst [vmem:[#allocation2 + $0x60] sm:$0xff] %v1285_v24  ;;  %v1806_v47 = vpop.f32.mrb[22].mxu1 }
 0x2aa   : > { %v1288_v18 = vadd.f32 %v1806_v47, %v1111_v10  ;;  %v1264_v28 = vpop.f32.mrb[23].mxu1 }
 0x2ab   : > { %v1287_v27 = vadd.f32 %v1264_v28, %v1110_v26 }
 0x2ac   : > { %1304 = vst [vmem:[#allocation2 + $0x78] sm:$0xff] %v1288_v18 }
 0x2ad   : > { %1303 = vst [vmem:[#allocation2 + $0x70] sm:$0xff] %v1287_v27 }
 0x2ae PF: > { %p1305_p7 = scmp.eq.s32.totalorder %s2239_s15, 4 }
 0x2af   : > { %v1310_v30 = vld [vmem:[#allocation2] sm:$0xff] (%p1305_p7)  ;;  %v1311_v33 = vld [vmem:[#allocation2 + $0x8] sm:$0xff] (%p1305_p7)  ;;  %v1312_v46 = vld [vmem:[#allocation2 + $0x10] sm:$0xff] (%p1305_p7) }
 0x2b0   : > { %1309 = sbr.rel (!%p1305_p7) target bundleno = 696 (0x2b8), region = 60  ;;  %1326 = vst [vmem:[%s2871_s7] sm:$0xff] (%p1305_p7), %v1310_v30  ;;  %1327 = vst [vmem:[%s2871_s7 + $0x8] sm:$0xff] (%p1305_p7), %v1311_v33  ;;  %v1313_v21 = vld [vmem:[#allocation2 + $0x18] sm:$0xff] (%p1305_p7)  ;;  %v1314_v17 = vld [vmem:[#allocation2 + $0x20] sm:$0xff] (%p1305_p7) }
 0x2b1   : > { %1328 = vst [vmem:[%s2871_s7 + $0x10] sm:$0xff] (%p1305_p7), %v1312_v46  ;;  %v1315_v57 = vld [vmem:[#allocation2 + $0x28] sm:$0xff] (%p1305_p7)  ;;  %1329 = vst [vmem:[%s2871_s7 + $0x18] sm:$0xff] (%p1305_p7), %v1313_v21  ;;  %v1316_v29 = vld [vmem:[#allocation2 + $0x30] sm:$0xff] (%p1305_p7) }
 0x2b2   : > { %1330 = vst [vmem:[%s2871_s7 + $0x20] sm:$0xff] (%p1305_p7), %v1314_v17  ;;  %1331 = vst [vmem:[%s2871_s7 + $0x28] sm:$0xff] (%p1305_p7), %v1315_v57  ;;  %v1317_v35 = vld [vmem:[#allocation2 + $0x38] sm:$0xff] (%p1305_p7)  ;;  %v1318_v31 = vld [vmem:[#allocation2 + $0x40] sm:$0xff] (%p1305_p7) }
 0x2b3   : > { %1332 = vst [vmem:[%s2871_s7 + $0x30] sm:$0xff] (%p1305_p7), %v1316_v29  ;;  %1333 = vst [vmem:[%s2871_s7 + $0x38] sm:$0xff] (%p1305_p7), %v1317_v35  ;;  %v1319_v38 = vld [vmem:[#allocation2 + $0x48] sm:$0xff] (%p1305_p7)  ;;  %v1320_v56 = vld [vmem:[#allocation2 + $0x50] sm:$0xff] (%p1305_p7) }
 0x2b4   : > { %1334 = vst [vmem:[%s2871_s7 + $0x40] sm:$0xff] (%p1305_p7), %v1318_v31  ;;  %v1321_v32 = vld [vmem:[#allocation2 + $0x58] sm:$0xff] (%p1305_p7)  ;;  %1335 = vst [vmem:[%s2871_s7 + $0x48] sm:$0xff] (%p1305_p7), %v1319_v38  ;;  %v1322_v1 = vld [vmem:[#allocation2 + $0x60] sm:$0xff] (%p1305_p7) }
 0x2b5   : > { %1336 = vst [vmem:[%s2871_s7 + $0x50] sm:$0xff] (%p1305_p7), %v1320_v56  ;;  %1337 = vst [vmem:[%s2871_s7 + $0x58] sm:$0xff] (%p1305_p7), %v1321_v32  ;;  %v1323_v13 = vld [vmem:[#allocation2 + $0x68] sm:$0xff] (%p1305_p7)  ;;  %v1324_v34 = vld [vmem:[#allocation2 + $0x70] sm:$0xff] (%p1305_p7) }
 0x2b6   : > { %1338 = vst [vmem:[%s2871_s7 + $0x60] sm:$0xff] (%p1305_p7), %v1322_v1  ;;  %1339 = vst [vmem:[%s2871_s7 + $0x68] sm:$0xff] (%p1305_p7), %v1323_v13  ;;  %v1325_v5 = vld [vmem:[#allocation2 + $0x78] sm:$0xff] (%p1305_p7) }
 0x2b7   : > { %1340 = vst [vmem:[%s2871_s7 + $0x70] sm:$0xff] %v1324_v34  ;;  %1341 = vst [vmem:[%s2871_s7 + $0x78] sm:$0xff] %v1325_v5 }
 0x2b8 PF: > { %s33_s17 = sadd.s32 1, %s2247_s17   ;;  %s2898_s18 = smov %s2389_s12 }
 0x2b9   : > { %p30_p4 = scmp.ge.s32.totalorder %s33_s17, 7   ;;  %s2899_s8 = sld [smem:[#allocation17_spill]] }
 0x2ba   : > { %s2900_s1 = smov %s2219_s10  ;;  %s2901_s10 = smov %s2223_s11 }
 0x2bb   : > { %s2902_s11 = smov %s2471_s9  ;;  %s2903_s12 = smov %s2231_s13 }
 0x2bc   : > { %s2904_s13 = smov %s2235_s14  ;;  %s2905_s14 = smov %s2898_s18 }
 0x2bd   : > { %s2906_s15 = smov %s2243_s16  ;;  %32 = sbr.rel (!%p30_p4) target bundleno = 34 (0x22), region = 114 }
 0x2bf   : > { %s2907_s16 = smov %s2899_s8 }
 0x2c4   :  { %1364 = vsyncpa [#allocation7], 1 }
 0x2c5   :  { %1366 = vsyncpa [#allocation7 + $0x1], 1 }
 0x2c6   :  { %1367 = vsyncpa [#allocation9], 1 }
 0x2c7   :  { %1369 = vsyncpa [#allocation9 + $0x1], 1 }

</bundles_post_ra>
